<compile_context>
chip_gen: v5e
topology: v5e:2x2
jax: 0.10.0
libtpu: 0.0.40
codegen_flags: <defaults>
</compile_context>

<pallas_src>
import numpy as np
import jax
import jax.numpy as jnp
from jax.experimental import pallas as pl
from jax.experimental.pallas import tpu as pltpu


def _cdiv(a, b):
    return (a + b - 1) // b


def _round_up(x, m):
    return ((x + m - 1) // m) * m


def _edge_length_loss_kernel(sq_p_ref, sq_g_ref, out_ref):
    """Blocks: (TR, C) f32 squared edge lengths (pred / gt); out: (1, 1, C)."""
    len_p = jnp.sqrt(sq_p_ref[...])                    # (TR, C) pred edge lengths
    len_g = jnp.sqrt(sq_g_ref[...])                    # (TR, C) gt   edge lengths
    diff = jnp.abs(len_p - len_g)                      # (TR, C)
    # Reduce the sublane/row axis; lanes stay dense (padding rows are zeros).
    out_ref[...] = jnp.sum(diff, axis=0).reshape(out_ref.shape)


def make_edge_length_loss(face, *, lane_cols=512):
    """Returns a jitted fn(coord_out, coord_gt) -> scalar loss (EdgeLengthLoss)."""
    face = np.asarray(face, dtype=np.int32)
    assert face.ndim == 2 and face.shape[1] == 3, "face must be (F, 3)"
    # Edge endpoint index lists: (f0,f1), (f0,f2), (f1,f2) for every face.
    idx_a = np.concatenate([face[:, 0], face[:, 0], face[:, 1]]).astype(np.int32)
    idx_b = np.concatenate([face[:, 1], face[:, 2], face[:, 2]]).astype(np.int32)
    num_edges = int(idx_a.shape[0])                    # E = 3 * F
    idx_a_j = jnp.asarray(idx_a)
    idx_b_j = jnp.asarray(idx_b)

    # Generation-dependent tile budgets (trace-time query; fall back v7x-safe).
    try:
        vmem_cap = int(getattr(pltpu.get_tpu_info(), "vmem_capacity_bytes",
                               64 * 1024 * 1024))
    except Exception:  # pragma: no cover - CPU / older jax fallback
        vmem_cap = 64 * 1024 * 1024
    if vmem_cap >= 128 * 1024 * 1024:                  # v5e / v6e: 128 MiB VMEM
        block_bytes = 8 * 1024 * 1024                  # per-input block
        vmem_limit = 96 * 1024 * 1024
    else:                                              # v7x: 64 MiB VMEM per TC
        block_bytes = 6 * 1024 * 1024
        vmem_limit = 48 * 1024 * 1024

    C = int(lane_cols)
    assert C % 128 == 0, "lane_cols must be a multiple of 128"
    tr_cap = max(8, (block_bytes // (4 * C)) // 8 * 8)  # rows per tile (mult of 8)

    @jax.jit
    def loss_fn(coord_out, coord_gt):
        assert coord_out.shape == coord_gt.shape
        b, _, c = coord_out.shape
        assert c == 3, "coordinates must be 3-D"

        def edge_sq(x):
            # (B, V, 3) -> per-edge squared lengths, flattened to (B*E,).
            x = x.astype(jnp.float32)
            pa = jnp.take(x, idx_a_j, axis=1)          # (B, E, 3)
            pb = jnp.take(x, idx_b_j, axis=1)          # (B, E, 3)
            d = pa - pb
            return jnp.sum(d * d, axis=2).reshape(-1)  # (B*E,)

        total = b * num_edges
        rows_needed = _round_up(_cdiv(total, C), 8)
        num_tiles = _cdiv(rows_needed, tr_cap)
        if num_tiles == 1 and rows_needed >= 16:
            num_tiles = 2       # let v7x shard the row grid across both TCs
        tr = _round_up(_cdiv(rows_needed, num_tiles), 8)  # balanced, minimal pad
        rows_pad = num_tiles * tr

        def to_slab(flat):
            # Zero padding contributes |sqrt(0) - sqrt(0)| = 0 to the sum.
            flat = jnp.pad(flat, (0, rows_pad * C - total))
            return flat.reshape(rows_pad, C)

        sq_p = to_slab(edge_sq(coord_out))
        sq_g = to_slab(edge_sq(coord_gt))

        in_spec = pl.BlockSpec((tr, C), lambda i: (i, 0))
        partials = pl.pallas_call(
            _edge_length_loss_kernel,
            out_shape=jax.ShapeDtypeStruct((num_tiles, 1, C), jnp.float32),
            grid_spec=pltpu.PrefetchScalarGridSpec(
                num_scalar_prefetch=0,
                grid=(num_tiles,),
                in_specs=[in_spec, in_spec],
                out_specs=pl.BlockSpec((1, 1, C), lambda i: (i, 0, 0)),
            ),
            compiler_params=pltpu.CompilerParams(
                dimension_semantics=("parallel",),
                vmem_limit_bytes=vmem_limit,
            ),
        )(sq_p, sq_g)

        # Single normalization: mean over batch * all 3F edges (true count,
        # not the padded count).
        return jnp.sum(partials) / jnp.float32(b * num_edges)

    return loss_fn


def _reference(coord_out, coord_gt, face):
    """Pure-JAX reference matching the PyTorch EdgeLengthLoss module."""
    face = jnp.asarray(face, dtype=jnp.int32)

    def d(x, i, j):
        diff = x[:, face[:, i], :] - x[:, face[:, j], :]
        return jnp.sqrt(jnp.sum(diff ** 2, axis=2, keepdims=True))

    diff1 = jnp.abs(d(coord_out, 0, 1) - d(coord_gt, 0, 1))
    diff2 = jnp.abs(d(coord_out, 0, 2) - d(coord_gt, 0, 2))
    diff3 = jnp.abs(d(coord_out, 1, 2) - d(coord_gt, 1, 2))
    loss = jnp.concatenate([diff1, diff2, diff3], axis=1)
    return loss.mean()


if __name__ == "__main__":
    B, V = 2, 12
    # Small deterministic face connectivity (F=8 faces -> 24 edges).
    face = np.array(
        [
            [0, 1, 2], [2, 3, 4], [4, 5, 6], [6, 7, 8],
            [8, 9, 10], [10, 11, 0], [1, 3, 5], [7, 9, 11],
        ],
        dtype=np.int32,
    )

    key = jax.random.PRNGKey(0)
    k1, k2 = jax.random.split(key)
    coord_out = jax.random.normal(k1, (B, V, 3), dtype=jnp.float32)
    coord_gt = jax.random.normal(k2, (B, V, 3), dtype=jnp.float32)

    loss_fn = make_edge_length_loss(face)
    loss = jax.block_until_ready(loss_fn(coord_out, coord_gt))

    ref = jax.block_until_ready(_reference(coord_out, coord_gt, face))
    assert jnp.allclose(loss, ref, rtol=1e-5, atol=1e-5), (loss, ref)

    print("KERNEL_OK")
</pallas_src>

<mosaic_0001>
module attributes {stable_mosaic.version = 11 : i64} {
  func.func @_edge_length_loss_kernel(%arg0: i32, %arg1: memref<8x512xf32, #tpu.memory_space<vmem>>, %arg2: memref<8x512xf32, #tpu.memory_space<vmem>>, %arg3: memref<1x1x512xf32, #tpu.memory_space<vmem>>) attributes {dimension_semantics = [#tpu.dimension_semantics<parallel>], iteration_bounds = array<i64: 1>, scalar_prefetch = 0 : i64, scratch_operands = 0 : i64, tpu.core_type = #tpu.core_type<tc>, window_params = [{transform_indices = @transform_0, window_bounds = array<i64: 8, 512>}, {transform_indices = @transform_1, window_bounds = array<i64: 8, 512>}, {transform_indices = @transform_2, window_bounds = array<i64: 1, 1, 512>}]} {
    %c0 = arith.constant 0 : index
    %c0_0 = arith.constant 0 : index
    %0 = vector.load %arg1[%c0, %c0_0] : memref<8x512xf32, #tpu.memory_space<vmem>>, vector<8x512xf32>
    %1 = math.sqrt %0 : vector<8x512xf32>
    %c0_1 = arith.constant 0 : index
    %c0_2 = arith.constant 0 : index
    %2 = vector.load %arg2[%c0_1, %c0_2] : memref<8x512xf32, #tpu.memory_space<vmem>>, vector<8x512xf32>
    %3 = math.sqrt %2 : vector<8x512xf32>
    %4 = arith.subf %1, %3 : vector<8x512xf32>
    %5 = math.absf %4 : vector<8x512xf32>
    %cst = arith.constant dense<0.000000e+00> : vector<512xf32>
    %6 = vector.multi_reduction <add>, %5, %cst [0] : vector<8x512xf32> to vector<512xf32>
    %7 = vector.shape_cast %6 : vector<512xf32> to vector<1x1x512xf32>
    %c0_3 = arith.constant 0 : index
    %c0_4 = arith.constant 0 : index
    %c0_5 = arith.constant 0 : index
    %8 = vector.load %arg3[%c0_3, %c0_4, %c0_5] : memref<1x1x512xf32, #tpu.memory_space<vmem>>, vector<1x1x512xf32>
    tpu.vector_store %arg3[%c0_3, %c0_4, %c0_5], %7 {strides = array<i32>} : memref<1x1x512xf32, #tpu.memory_space<vmem>>, vector<1x1x512xf32>,
    return
  }
  func.func @transform_0(%arg0: i32) -> (i32, i32) {
    %c0_i32 = arith.constant 0 : i32
    %c0_i32_0 = arith.constant 0 : i32
    return %arg0, %c0_i32 : i32, i32
  }
  func.func @transform_1(%arg0: i32) -> (i32, i32) {
    %c0_i32 = arith.constant 0 : i32
    %c0_i32_0 = arith.constant 0 : i32
    return %arg0, %c0_i32 : i32, i32
  }
  func.func @transform_2(%arg0: i32) -> (i32, i32, i32) {
    %c0_i32 = arith.constant 0 : i32
    %c0_i32_0 = arith.constant 0 : i32
    %c0_i32_1 = arith.constant 0 : i32
    return %arg0, %c0_i32, %c0_i32_0 : i32, i32, i32
  }
}

</mosaic_0001>

<bundles_post_ra>
// kernel: loss_fn.1
= control target key start
LH: loop header
LB: loop body
LE: loop exit
PB: predicated region body
PF: predicated region fallthrough
CT: control target
= control target key end

     0   :  { %s338_s0 = inlined_call_operand.vmem [shape: f32[8,512], index: 0, kind: input, shape index: {}]   ;;  %s339_s1 = inlined_call_operand.vmem [shape: f32[8,512], index: 1, kind: input, shape index: {}]   ;;  %s340_s2 = inlined_call_operand.vmem [shape: f32[1,1,512], index: 2, kind: output, shape index: {}]  }
   0x1   :  { %v204_v0 = vld [vmem:[%s338_s0] sm:$0xff]  ;;  %v209_v1 = vld [vmem:[%s338_s0 + $0x8] sm:$0xff]  ;;  %v214_v2 = vld [vmem:[%s338_s0 + $0x10] sm:$0xff] }
   0x2   :  { %v219_v3 = vld [vmem:[%s338_s0 + $0x18] sm:$0xff]  ;;  %170 = vrsqrt.f32 %v204_v0  ;;  %v226_v4 = vld [vmem:[%s339_s1] sm:$0xff]  ;;  %v232_v5 = vld [vmem:[%s339_s1 + $0x8] sm:$0xff]  ;;  %vm22_vm0 = vcmp.eq.f32.partialorder %v204_v0, inf  ;;  %v25_v12 = vand.u32 2147483648, %v204_v0  ;;  %vm34_vm1 = vcmp.eq.f32.partialorder %v209_v1, inf }
   0x3   :  { %172 = vrsqrt.f32 %v209_v1  ;;  %v238_v6 = vld [vmem:[%s339_s1 + $0x10] sm:$0xff]  ;;  %v243_v7 = vld [vmem:[%s339_s1 + $0x18] sm:$0xff]  ;;  %v37_v16 = vand.u32 2147483648, %v209_v1  ;;  %vm46_vm2 = vcmp.eq.f32.partialorder %v214_v2, inf  ;;  %v49_v20 = vand.u32 2147483648, %v214_v2 }
   0x4   :  { %174 = vrsqrt.f32 %v214_v2  ;;  %v61_v22 = vand.u32 2147483648, %v219_v3  ;;  %vm24_vm3 = vcmp.eq.f32.partialorder %v204_v0, 0.0  ;;  %v77_v27 = vand.u32 2147483648, %v226_v4 }
   0x5   :  { %176 = vrsqrt.f32 %v219_v3  ;;  %vm36_vm4 = vcmp.eq.f32.partialorder %v209_v1, 0.0  ;;  %vm48_vm5 = vcmp.eq.f32.partialorder %v214_v2, 0.0  ;;  %vm74_vm6 = vcmp.eq.f32.partialorder %v226_v4, inf }
   0x6   :  { %178 = vrsqrt.f32 %v226_v4  ;;  %v89_v32 = vand.u32 2147483648, %v232_v5  ;;  %vm58_vm7 = vcmp.eq.f32.partialorder %v219_v3, inf  ;;  %vm76_vm8 = vcmp.eq.f32.partialorder %v226_v4, 0.0 }
   0x7   :  { %180 = vrsqrt.f32 %v232_v5  ;;  %vm86_vm9 = vcmp.eq.f32.partialorder %v232_v5, inf  ;;  %vm88_vm10 = vcmp.eq.f32.partialorder %v232_v5, 0.0  ;;  %vm98_vm11 = vcmp.eq.f32.partialorder %v238_v6, inf }
   0x8   :  { %v171_v8 = vpop.eup %170  ;;  %182 = vrsqrt.f32 %v238_v6  ;;  %vm60_vm12 = vcmp.eq.f32.partialorder %v219_v3, 0.0  ;;  %vm100_vm13 = vcmp.eq.f32.partialorder %v238_v6, 0.0  ;;  %vm110_vm14 = vcmp.eq.f32.partialorder %v243_v7, inf }
   0x9   :  { %v173_v9 = vpop.eup %172  ;;  %v16_v10 = vmul.f32 %v171_v8, %v204_v0  ;;  %184 = vrsqrt.f32 %v243_v7  ;;  %vm112_vm15 = vcmp.eq.f32.partialorder %v243_v7, 0.0 }
   0xa   :  { %v175_v11 = vpop.eup %174  ;;  %v28_v13 = vmul.f32 %v173_v9, %v209_v1 }
   0xb   :  { %v177_v14 = vpop.eup %176  ;;  %v17_v15 = vmul.f32 %v171_v8, %v16_v10  ;;  %v40_v17 = vmul.f32 %v175_v11, %v214_v2 }
   0xc   :  { %v179_v18 = vpop.eup %178  ;;  %v29_v19 = vmul.f32 %v173_v9, %v28_v13  ;;  %v52_v21 = vmul.f32 %v177_v14, %v219_v3  ;;  %v101_v13 = vand.u32 2147483648, %v238_v6 }
   0xd   :  { %v181_v23 = vpop.eup %180  ;;  %v18_v24 = vmul.f32 0.5, %v17_v15  ;;  %v41_v25 = vmul.f32 %v175_v11, %v40_v17  ;;  %v68_v26 = vmul.f32 %v179_v18, %v226_v4 }
   0xe   :  { %v183_v28 = vpop.eup %182  ;;  %v30_v29 = vmul.f32 0.5, %v29_v19  ;;  %v53_v30 = vmul.f32 %v177_v14, %v52_v21  ;;  %v80_v31 = vmul.f32 %v181_v23, %v232_v5 }
   0xf   :  { %v185_v33 = vpop.eup %184  ;;  %v19_v34 = vsub.f32 1.5, %v18_v24  ;;  %v42_v35 = vmul.f32 0.5, %v41_v25  ;;  %v69_v36 = vmul.f32 %v179_v18, %v68_v26  ;;  %v92_v37 = vmul.f32 %v183_v28, %v238_v6 }
  0x10   :  { %v31_v38 = vsub.f32 1.5, %v30_v29  ;;  %v54_v39 = vmul.f32 0.5, %v53_v30  ;;  %v81_v40 = vmul.f32 %v181_v23, %v80_v31  ;;  %v104_v41 = vmul.f32 %v185_v33, %v243_v7 }
  0x11   :  { %v20_v42 = vmul.f32 %v171_v8, %v19_v34  ;;  %v43_v43 = vsub.f32 1.5, %v42_v35  ;;  %v70_v44 = vmul.f32 0.5, %v69_v36  ;;  %v93_v45 = vmul.f32 %v183_v28, %v92_v37 }
  0x12   :  { %v32_v46 = vmul.f32 %v173_v9, %v31_v38  ;;  %v55_v47 = vsub.f32 1.5, %v54_v39  ;;  %v82_v48 = vmul.f32 0.5, %v81_v40  ;;  %v105_v49 = vmul.f32 %v185_v33, %v104_v41 }
  0x13   :  { %v21_v50 = vmul.f32 %v20_v42, %v204_v0  ;;  %v44_v51 = vmul.f32 %v175_v11, %v43_v43  ;;  %v71_v52 = vsub.f32 1.5, %v70_v44  ;;  %v94_v53 = vmul.f32 0.5, %v93_v45 }
  0x14   :  { %v33_v54 = vmul.f32 %v32_v46, %v209_v1  ;;  %v56_v55 = vmul.f32 %v177_v14, %v55_v47  ;;  %v83_v56 = vsub.f32 1.5, %v82_v48  ;;  %v106_v57 = vmul.f32 0.5, %v105_v49 }
  0x15   :  { %v23_v58 = vsel %vm22_vm0, %v204_v0, %v21_v50  ;;  %v45_v59 = vmul.f32 %v44_v51, %v214_v2  ;;  %v72_v60 = vmul.f32 %v179_v18, %v71_v52  ;;  %v95_v61 = vsub.f32 1.5, %v94_v53 }
  0x16   :  { %v35_v62 = vsel %vm34_vm1, %v209_v1, %v33_v54  ;;  %v57_v63 = vmul.f32 %v56_v55, %v219_v3  ;;  %v84_v8 = vmul.f32 %v181_v23, %v83_v56  ;;  %v26_v14 = vsel %vm24_vm3, %v25_v12, %v23_v58 }
  0x17   :  { %v47_v9 = vsel %vm46_vm2, %v214_v2, %v45_v59  ;;  %v73_v10 = vmul.f32 %v72_v60, %v226_v4  ;;  %v96_v11 = vmul.f32 %v183_v28, %v95_v61  ;;  %v107_v17 = vsub.f32 1.5, %v106_v57 }
  0x18   :  { %v85_v15 = vmul.f32 %v84_v8, %v232_v5  ;;  %v38_v18 = vsel %vm36_vm4, %v37_v16, %v35_v62  ;;  %v50_v19 = vsel %vm48_vm5, %v49_v20, %v47_v9  ;;  %v59_v21 = vsel %vm58_vm7, %v219_v3, %v57_v63 }
  0x19   :  { %v75_v0 = vsel %vm74_vm6, %v226_v4, %v73_v10  ;;  %v97_v12 = vmul.f32 %v96_v11, %v238_v6  ;;  %v108_v16 = vmul.f32 %v185_v33, %v107_v17  ;;  %v113_v24 = vand.u32 2147483648, %v243_v7 }
  0x1a   :  { %v78_v23 = vsel %vm76_vm8, %v77_v27, %v75_v0  ;;  %v87_v1 = vsel %vm86_vm9, %v232_v5, %v85_v15  ;;  %v62_v5 = vsel %vm60_vm12, %v61_v22, %v59_v21  ;;  %vm154_vm0 = vcmask 1040384  }
  0x1b   :  { %v90_v2 = vsel %vm88_vm10, %v89_v32, %v87_v1  ;;  %v99_v20 = vsel %vm98_vm11, %v238_v6, %v97_v12  ;;  %v115_v25 = vsub.f32 %v26_v14, %v78_v23  ;;  %v109_v4 = vmul.f32 %v108_v16, %v243_v7 }
  0x1c   :  { %v102_v26 = vsel %vm100_vm13, %v101_v13, %v99_v20  ;;  %v116_v27 = vsub.f32 %v38_v18, %v90_v2  ;;  %v161_v56 = vlaneseq  ;;  %vm156_vm1 = vcmask 1042434  }
  0x1d   :  { %v117_v28 = vsub.f32 %v50_v19, %v102_v26  ;;  %v119_v29 = vand.u32 2147483647, %v115_v25  ;;  %v111_v30 = vsel %vm110_vm14, %v243_v7, %v109_v4  ;;  %vm158_vm2 = vcmask 1041408  }
  0x1e   :  { %v120_v31 = vand.u32 2147483647, %v116_v27  ;;  %v114_v32 = vsel %vm112_vm15, %v113_v24, %v111_v30  ;;  %vm163_vm3 = vcmp.lt.s32.totalorder %v161_v56, 512 }
  0x1f   :  { %v121_v6 = vand.u32 2147483647, %v117_v28  ;;  %v123_v33 = vrot.slane %v119_v29, 4  ;;  %v118_v34 = vsub.f32 %v62_v5, %v114_v32 }
  0x20   :  { %v129_v35 = vrot.slane %v120_v31, 4 }
  0x21   :  { %v124_v36 = vadd.f32 %v123_v33, %v119_v29  ;;  %v135_v37 = vrot.slane %v121_v6, 4  ;;  %v122_v38 = vand.u32 2147483647, %v118_v34 }
  0x22   :  { %v130_v39 = vadd.f32 %v129_v35, %v120_v31 }
  0x23   :  { %v125_v40 = vrot.slane %v124_v36, 2  ;;  %v136_v41 = vadd.f32 %v135_v37, %v121_v6  ;;  %v141_v22 = vrot.slane %v122_v38, 4 }
  0x24   :  { %v131_v3 = vrot.slane %v130_v39, 2 }
  0x25   :  { %v126_v42 = vadd.f32 %v125_v40, %v124_v36  ;;  %v137_v43 = vrot.slane %v136_v41, 2  ;;  %v142_v45 = vadd.f32 %v141_v22, %v122_v38 }
  0x26   :  { %v132_v44 = vadd.f32 %v131_v3, %v130_v39 }
  0x27   :  { %v138_v46 = vadd.f32 %v137_v43, %v136_v41  ;;  %v127_v7 = vrot.slane %v126_v42, 1  ;;  %v143_v48 = vrot.slane %v142_v45, 2 }
  0x28   :  { %v133_v47 = vrot.slane %v132_v44, 1 }
  0x29   :  { %v139_v49 = vrot.slane %v138_v46, 1  ;;  %v144_v51 = vadd.f32 %v143_v48, %v142_v45  ;;  %v128_v53 = vadd.f32 %v127_v7, %v126_v42 }
  0x2a   :  { %v134_v50 = vadd.f32 %v133_v47, %v132_v44 }
  0x2b   :  { %v140_v52 = vadd.f32 %v139_v49, %v138_v46  ;;  %v145_v54 = vrot.slane %v144_v51, 1 }
  0x2c   :  { %v151_v55 = vrot.slane %v134_v50, 7 }
  0x2d   :  { %v146_v57 = vadd.f32 %v145_v54, %v144_v51  ;;  %v152_v58 = vrot.slane %v140_v52, 6 }
  0x2e   :  { %v155_v60 = vsel %vm154_vm0, %v128_v53, %v151_v55 }
  0x2f   :  { %v153_v59 = vrot.slane %v146_v57, 5 }
  0x31   :  { %v157_v61 = vsel %vm156_vm1, %v152_v58, %v153_v59 }
  0x32   :  { %v159_v62 = vsel %vm158_vm2, %v155_v60, %v157_v61 }
  0x33   :  { %165 = vst.msk [vmem:[%s340_s2] sm:$0xf] %vm163_vm3, %v159_v62 }

</bundles_post_ra>
